<compile_context>
chip_gen: v6e
topology: v6e:2x2x1
jax: 0.10.0
libtpu: 0.0.40
codegen_flags: <defaults>
</compile_context>

<pallas_src>
import functools

import jax
import jax.numpy as jnp
from jax.experimental import pallas as pl
from jax.experimental.pallas import tpu as pltpu

_EPS = 1e-5           # eps of InstanceNorm2d / AdaptiveInstanceNorm2d
_LRELU_SLOPE = 0.1    # F.leaky_relu(..., 0.1) inside SFT
_TILE_M = 256         # M tile for the generic tiled matmul path
_VMEM_BUDGET = 20 * 1024 * 1024   # conservative per-kernel budget (v7x-safe)


def _round_up(x, m):
    return ((x + m - 1) // m) * m


def _store_c(c):
    """Stored (lane-padded) channel count for internal activations."""
    return _round_up(c, 128)


def _choose_tile_m(M, want):
    if M <= want:
        return _round_up(M, 8)
    for t in (want, 128, 64, 32, 16, 8):
        if t <= want and M % t == 0:
            return t
    return want


def _pad_cols(v, n):
    return v if v.shape[-1] == n else jnp.pad(v, ((0, 0), (0, n - v.shape[-1])))


def _apply_act(x, act):
    if act == "none":
        return x
    if act == "relu":
        return jnp.maximum(x, 0.0)
    if act == "tanh":
        return jnp.tanh(x)
    if act == "lrelu":
        return jnp.where(x >= 0.0, x, _LRELU_SLOPE * x)
    raise ValueError(f"unknown activation: {act}")


def _conv_img_vmem_ok(x_elems, k, ns, rows, has_res):
    b = 2 * x_elems * 2 + 2 * k * ns * 2 + rows * ns * 4 + 2 * rows * ns * 4
    if has_res:
        b += 2 * rows * ns * 2
    return b < _VMEM_BUDGET


# ----------------------------------------------------------------------------
# Pallas kernels
# ----------------------------------------------------------------------------
def _mm_bias_act_kernel(a_ref, w_ref, b_ref, o_ref, *, act):
    acc = jnp.dot(a_ref[...], w_ref[...], preferred_element_type=jnp.float32)
    acc = acc + b_ref[...]
    o_ref[...] = _apply_act(acc, act).astype(o_ref.dtype)


def _mm_sft_kernel(a_ref, w_ref, b_ref, x_ref, o_ref, *, c):
    # gb = [gamma | beta] (split at a lane-tile boundary); fused x*gamma + beta.
    gb = jnp.dot(a_ref[...], w_ref[...], preferred_element_type=jnp.float32)
    gb = gb + b_ref[...]
    x = x_ref[...].astype(jnp.float32)
    o_ref[...] = (x * gb[:, :c] + gb[:, c:2 * c]).astype(o_ref.dtype)


def _conv_img_kernel(x_ref, w_ref, b_ref, g_ref, be_ref, *rest,
                     kh, kw, oh, ow, eps, act, norm, has_res):
    """One grid step == one image.

    Either a direct conv (kh*kw taps sliced from the padded NHWC block,
    accumulated into a VMEM f32 scratch) or a single matmul on pre-built
    im2col patches (kh*kw == 1).  Optional fused epilogue:
    bias -> per-(image, channel) instance norm with affine (g, be) -> act ->
    residual add.
    """
    if has_res:
        r_ref, o_ref, acc_ref = rest
    else:
        o_ref, acc_ref = rest
    taps = kh * kw
    if taps == 1:
        acc = jnp.dot(x_ref[0], w_ref[0], preferred_element_type=jnp.float32)
    else:
        cs = x_ref.shape[-1]
        for t in range(taps):
            di, dj = divmod(t, kw)
            patch = x_ref[0, di:di + oh, dj:dj + ow, :].reshape(oh * ow, cs)
            contrib = jnp.dot(patch, w_ref[t], preferred_element_type=jnp.float32)
            if t == 0:
                acc_ref[...] = contrib
            else:
                acc_ref[...] += contrib
        acc = acc_ref[...]
    acc = acc + b_ref[...]
    if norm:
        # Biased spatial variance, like torch InstanceNorm2d / batch_norm(True).
        mean = jnp.mean(acc, axis=0, keepdims=True)
        xc = acc - mean
        var = jnp.mean(xc * xc, axis=0, keepdims=True)
        acc = xc * jax.lax.rsqrt(var + eps) * g_ref[0] + be_ref[0]
    acc = _apply_act(acc, act)
    if has_res:
        acc = acc + r_ref[0].astype(jnp.float32)
    o_ref[0] = acc.astype(o_ref.dtype)


def _inorm_act_kernel(x_ref, w_ref, b_ref, o_ref, *, eps, act):
    x = x_ref[...].astype(jnp.float32)
    mean = jnp.mean(x, axis=1, keepdims=True)
    xc = x - mean
    var = jnp.mean(xc * xc, axis=1, keepdims=True)
    y = xc * jax.lax.rsqrt(var + eps) * w_ref[...] + b_ref[...]
    o_ref[...] = _apply_act(y, act).astype(o_ref.dtype)


def _inorm_res_kernel(x_ref, w_ref, b_ref, r_ref, o_ref, *, eps, act):
    x = x_ref[...].astype(jnp.float32)
    mean = jnp.mean(x, axis=1, keepdims=True)
    xc = x - mean
    var = jnp.mean(xc * xc, axis=1, keepdims=True)
    y = xc * jax.lax.rsqrt(var + eps) * w_ref[...] + b_ref[...]
    y = _apply_act(y, act) + r_ref[...].astype(jnp.float32)
    o_ref[...] = y.astype(o_ref.dtype)


def _avgpool_kernel(x_ref, o_ref):
    o_ref[...] = jnp.mean(x_ref[...].astype(jnp.float32), axis=1, keepdims=True)


# ----------------------------------------------------------------------------
# Pallas wrappers
# ----------------------------------------------------------------------------
def matmul_bias_act(a, w, bias, act="none", out_dtype=jnp.bfloat16,
                    tile_m=_TILE_M):
    """(M, K) @ (K, N) + bias with fused activation (bf16 MXU, f32 acc)."""
    M, K = a.shape
    Kw, N = w.shape
    assert K == Kw
    Np = _round_up(N, 128)
    wp = w.astype(jnp.bfloat16)
    bp = bias.reshape(1, -1).astype(jnp.float32)
    if Np != N:
        wp = jnp.pad(wp, ((0, 0), (0, Np - N)))
        bp = jnp.pad(bp, ((0, 0), (0, Np - N)))

    tm = _choose_tile_m(M, tile_m)
    Mp = _round_up(M, tm)
    ap = a.astype(jnp.bfloat16)
    if Mp != M:
        ap = jnp.pad(ap, ((0, Mp - M), (0, 0)))

    out = pl.pallas_call(
        functools.partial(_mm_bias_act_kernel, act=act),
        out_shape=jax.ShapeDtypeStruct((Mp, Np), out_dtype),
        grid=(Mp // tm,),
        in_specs=[
            pl.BlockSpec((tm, K), lambda i: (i, 0)),
            pl.BlockSpec((K, Np), lambda i: (0, 0)),
            pl.BlockSpec((1, Np), lambda i: (0, 0)),
        ],
        out_specs=pl.BlockSpec((tm, Np), lambda i: (i, 0)),
        compiler_params=pltpu.CompilerParams(dimension_semantics=("parallel",)),
    )(ap, wp, bp)
    if Mp != M or Np != N:
        out = out[:M, :N]
    return out


def sft_matmul_modulate(h, w, bias, x, tile_m=_TILE_M):
    """out = x * (h@w+b)[:, :C] + (h@w+b)[:, C:]  (SFT modulation fused)."""
    M, K = h.shape
    Kw, N = w.shape
    C = x.shape[1]
    assert Kw == K and N == 2 * C
    tm = _choose_tile_m(M, tile_m)
    Mp = _round_up(M, tm)
    hp = h.astype(jnp.bfloat16)
    xp = x.astype(jnp.bfloat16)
    if Mp != M:
        hp = jnp.pad(hp, ((0, Mp - M), (0, 0)))
        xp = jnp.pad(xp, ((0, Mp - M), (0, 0)))
    out = pl.pallas_call(
        functools.partial(_mm_sft_kernel, c=C),
        out_shape=jax.ShapeDtypeStruct((Mp, C), jnp.bfloat16),
        grid=(Mp // tm,),
        in_specs=[
            pl.BlockSpec((tm, K), lambda i: (i, 0)),
            pl.BlockSpec((K, N), lambda i: (0, 0)),
            pl.BlockSpec((1, N), lambda i: (0, 0)),
            pl.BlockSpec((tm, C), lambda i: (i, 0)),
        ],
        out_specs=pl.BlockSpec((tm, C), lambda i: (i, 0)),
        compiler_params=pltpu.CompilerParams(dimension_semantics=("parallel",)),
    )(hp, w.astype(jnp.bfloat16), bias.reshape(1, N).astype(jnp.float32), xp)
    return out[:M] if Mp != M else out


def conv_img_call(x, w_taps, bias, gamma, beta, residual, *, kh, kw, oh, ow,
                  act, norm, out_dtype, eps=_EPS):
    """Per-image conv (+ optional fused instance-norm / act / residual).

    x: (B, Hp, Wp, Cs) for the direct path (kh*kw > 1), or (B, oh*ow, K)
       pre-patched for the im2col path (kh == kw == 1).
    """
    B = x.shape[0]
    ns = w_taps.shape[-1]
    rows = oh * ow
    has_res = residual is not None
    kern = functools.partial(_conv_img_kernel, kh=kh, kw=kw, oh=oh, ow=ow,
                             eps=eps, act=act, norm=norm, has_res=has_res)
    x_block = (1,) + x.shape[1:]
    x_nd = x.ndim
    in_specs = [
        pl.BlockSpec(x_block, lambda b: (b,) + (0,) * (x_nd - 1)),
        pl.BlockSpec(w_taps.shape, lambda b: (0, 0, 0)),
        pl.BlockSpec((1, ns), lambda b: (0, 0)),
        pl.BlockSpec((1, 1, ns), lambda b: (b, 0, 0)),
        pl.BlockSpec((1, 1, ns), lambda b: (b, 0, 0)),
    ]
    args = [x, w_taps, bias, gamma, beta]
    if has_res:
        in_specs.append(pl.BlockSpec((1, rows, ns), lambda b: (b, 0, 0)))
        args.append(residual)
    return pl.pallas_call(
        kern,
        out_shape=jax.ShapeDtypeStruct((B, rows, ns), out_dtype),
        grid=(B,),
        in_specs=in_specs,
        out_specs=pl.BlockSpec((1, rows, ns), lambda b: (b, 0, 0)),
        scratch_shapes=[pltpu.VMEM((rows, ns), jnp.float32)],
        compiler_params=pltpu.CompilerParams(dimension_semantics=("parallel",)),
    )(*args)


def instance_norm_act(x3, weight, bias, act="none", residual=None, eps=_EPS,
                      out_dtype=jnp.bfloat16):
    """Per-(b, c) normalization of (B, S, C) data with per-(b, c) affine params
    (shape (B, C)); optional fused residual add.  bf16 in/out, f32 stats."""
    B, S, C = x3.shape
    ct = 128 if C % 128 == 0 else C
    w3 = weight.reshape(B, 1, C).astype(jnp.float32)
    b3 = bias.reshape(B, 1, C).astype(jnp.float32)
    spec = pl.BlockSpec((1, S, ct), lambda b, c: (b, 0, c))
    pspec = pl.BlockSpec((1, 1, ct), lambda b, c: (b, 0, c))
    if residual is None:
        kern = functools.partial(_inorm_act_kernel, eps=eps, act=act)
        in_specs = [spec, pspec, pspec]
        args = (x3, w3, b3)
    else:
        kern = functools.partial(_inorm_res_kernel, eps=eps, act=act)
        in_specs = [spec, pspec, pspec, spec]
        args = (x3, w3, b3, residual)
    # TODO(synk): for very large S a two-pass (stats then normalize) spatial
    # tiling would bound VMEM further on v7x; not needed at these shapes.
    return pl.pallas_call(
        kern,
        out_shape=jax.ShapeDtypeStruct((B, S, C), out_dtype),
        grid=(B, C // ct),
        in_specs=in_specs,
        out_specs=spec,
        compiler_params=pltpu.CompilerParams(
            dimension_semantics=("parallel", "parallel")),
    )(*args)


def adaptive_avg_pool_1(x3):
    B, S, C = x3.shape
    ct = 128 if C % 128 == 0 else C
    return pl.pallas_call(
        _avgpool_kernel,
        out_shape=jax.ShapeDtypeStruct((B, 1, C), jnp.float32),
        grid=(B, C // ct),
        in_specs=[pl.BlockSpec((1, S, ct), lambda b, c: (b, 0, c))],
        out_specs=pl.BlockSpec((1, 1, ct), lambda b, c: (b, 0, c)),
        compiler_params=pltpu.CompilerParams(
            dimension_semantics=("parallel", "parallel")),
    )(x3)


# ----------------------------------------------------------------------------
# Convolution glue (NHWC, channels stored lane-padded to multiples of 128)
# ----------------------------------------------------------------------------
def pad2d(x, p, padtype):
    if p == 0:
        return x
    mode = "reflect" if padtype == "reflection" else "constant"
    return jnp.pad(x, ((0, 0), (p, p), (p, p), (0, 0)), mode=mode)


def im2col(x, kh, kw, stride):
    B, Hp, Wp, C = x.shape
    OH = (Hp - kh) // stride + 1
    OW = (Wp - kw) // stride + 1
    cols = []
    for i in range(kh):
        for j in range(kw):
            cols.append(x[:, i:i + stride * OH:stride, j:j + stride * OW:stride, :])
    p = jnp.stack(cols, axis=3)                       # (B, OH, OW, kh*kw, C)
    return p.reshape(B, OH * OW, kh * kw * C), OH, OW


def conv2d_block(x, p, *, stride=1, padding=0, padtype="zero", act="none",
                 norm=False, gamma=None, beta=None, residual=None,
                 out_dtype=jnp.bfloat16):
    """ConvBlock forward.  x: (B, H, W, Cs) with lane-padded channels (or the
    raw 3-channel image); weights in PyTorch layout (Cout, Cin, kh, kw).
    `norm=True` fuses an instance-norm (optionally AdaIN via gamma/beta) into
    the conv epilogue; `residual` fuses `residual + out`."""
    B, H, W, cin_act = x.shape
    cout, cin, kh, kw = p["w"].shape
    cout_s = _store_c(cout)

    xp = pad2d(x, padding, padtype).astype(jnp.bfloat16)
    Hp, Wp = xp.shape[1], xp.shape[2]
    OH = (Hp - kh) // stride + 1
    OW = (Wp - kw) // stride + 1
    rows = OH * OW

    w4 = jnp.transpose(p["w"], (2, 3, 1, 0))          # (kh, kw, cin, cout)
    w4 = jnp.pad(w4, ((0, 0), (0, 0), (0, cin_act - cin),
                      (0, cout_s - cout))).astype(jnp.bfloat16)
    bias = jnp.pad(p["b"], (0, cout_s - cout)).astype(jnp.float32).reshape(1, cout_s)
    if gamma is None:
        g = jnp.ones((B, 1, cout_s), jnp.float32)
        be = jnp.zeros((B, 1, cout_s), jnp.float32)
    else:
        g = _pad_cols(gamma, cout_s).reshape(B, 1, cout_s).astype(jnp.float32)
        be = _pad_cols(beta, cout_s).reshape(B, 1, cout_s).astype(jnp.float32)
    res3 = None if residual is None else residual.reshape(B, rows, cout_s)

    # Direct (tap-fused) path: stride-1, lane-aligned channels, whole image/step.
    direct_ok = (stride == 1 and cin_act % 128 == 0 and OW % 8 == 0 and
                 _conv_img_vmem_ok(Hp * Wp * cin_act, kh * kw * cin_act,
                                   cout_s, rows, res3 is not None))
    if direct_ok:
        out = conv_img_call(xp, w4.reshape(kh * kw, cin_act, cout_s), bias, g, be,
                            res3, kh=kh, kw=kw, oh=OH, ow=OW, act=act,
                            norm=norm, out_dtype=out_dtype)
        return out.reshape(B, OH, OW, cout_s)

    # im2col path (strided convs / 3-channel inputs / tiny spatial maps).
    patches, _, _ = im2col(xp, kh, kw, stride)        # (B, rows, K)
    K = kh * kw * cin_act
    wmat = w4.reshape(K, cout_s)
    if ((norm or res3 is not None) and
            _conv_img_vmem_ok(rows * K, K, cout_s, rows, res3 is not None)):
        out = conv_img_call(patches, wmat.reshape(1, K, cout_s), bias, g, be,
                            res3, kh=1, kw=1, oh=rows, ow=1, act=act,
                            norm=norm, out_dtype=out_dtype)
        return out.reshape(B, OH, OW, cout_s)

    # Fallback for huge images: tiled matmul + standalone norm.
    needs_post = norm or res3 is not None
    out = matmul_bias_act(patches.reshape(B * rows, K), wmat, bias[0],
                          act=("none" if needs_post else act),
                          out_dtype=(jnp.bfloat16 if needs_post else out_dtype))
    out = out.reshape(B, rows, cout_s)
    if needs_post:
        out = instance_norm_act(out, g[:, 0, :], be[:, 0, :], act=act,
                                residual=res3, out_dtype=out_dtype)
    return out.reshape(B, OH, OW, cout_s)


def _convT_weight_taps(w, cin_act, cout_s):
    """ConvTranspose2d(k=3, s=2, p=1, op=1) as a matmul over 2x2 input patches:
    out[2i+r, 2j+s] = sum_{di,dj} x[i+di, j+dj] . Wb[(di,dj),(r,s)]."""
    cin, cout = w.shape[0], w.shape[1]
    wc = jnp.transpose(jnp.flip(w, (2, 3)), (2, 3, 0, 1))   # [ki, kj, cin, cout]
    Wb = jnp.zeros((2, 2, cin, 2, 2, cout), w.dtype)
    Wb = Wb.at[0, 0, :, 0, 0, :].set(wc[1, 1])
    Wb = Wb.at[0, 0, :, 0, 1, :].set(wc[1, 0])
    Wb = Wb.at[0, 1, :, 0, 1, :].set(wc[1, 2])
    Wb = Wb.at[0, 0, :, 1, 0, :].set(wc[0, 1])
    Wb = Wb.at[1, 0, :, 1, 0, :].set(wc[2, 1])
    Wb = Wb.at[0, 0, :, 1, 1, :].set(wc[0, 0])
    Wb = Wb.at[0, 1, :, 1, 1, :].set(wc[0, 2])
    Wb = Wb.at[1, 0, :, 1, 1, :].set(wc[2, 0])
    Wb = Wb.at[1, 1, :, 1, 1, :].set(wc[2, 2])
    Wb = jnp.pad(Wb, ((0, 0), (0, 0), (0, cin_act - cin),
                      (0, 0), (0, 0), (0, cout_s - cout)))
    return Wb.reshape(4, cin_act, 4 * cout_s).astype(jnp.bfloat16)


def conv_transpose_raw(x, w, b):
    """NHWC ConvTranspose2d(3, stride=2, padding=1, output_padding=1), sub-pixel
    lowering.  Returns (B, 2H, 2W, cout_s) bf16 (no norm/act)."""
    B, H, W, cin_act = x.shape
    cin, cout = w.shape[0], w.shape[1]
    cout_s = _store_c(cout)
    ns = 4 * cout_s
    w_taps = _convT_weight_taps(w, cin_act, cout_s)
    bias = jnp.tile(jnp.pad(b, (0, cout_s - cout)), 4).astype(jnp.float32)
    bias = bias.reshape(1, ns)
    g = jnp.ones((B, 1, ns), jnp.float32)
    be = jnp.zeros((B, 1, ns), jnp.float32)
    xp = jnp.pad(x, ((0, 0), (0, 1), (0, 1), (0, 0))).astype(jnp.bfloat16)

    if (W % 8 == 0 and cin_act % 128 == 0 and
            _conv_img_vmem_ok((H + 1) * (W + 1) * cin_act, 4 * cin_act, ns,
                              H * W, False)):
        y = conv_img_call(xp, w_taps, bias, g, be, None, kh=2, kw=2, oh=H, ow=W,
                          act="none", norm=False, out_dtype=jnp.bfloat16)
    else:
        patches, _, _ = im2col(xp, 2, 2, 1)           # (B, H*W, 4*cin_act)
        K = 4 * cin_act
        y = conv_img_call(patches, w_taps.reshape(1, K, ns), bias, g, be, None,
                          kh=1, kw=1, oh=H * W, ow=1, act="none", norm=False,
                          out_dtype=jnp.bfloat16)
    # pixel shuffle on bf16 data.
    # TODO(synk): fold this interleave into the kernel's output index_map.
    y = y.reshape(B, H, W, 2, 2, cout_s).transpose(0, 1, 3, 2, 4, 5)
    return y.reshape(B, 2 * H, 2 * W, cout_s)


def conv_transpose_block(x, p):
    """ConvTranspose2d -> InstanceNorm2d -> ReLU."""
    y = conv_transpose_raw(x, p["w"], p["b"])
    B, H2, W2, C = y.shape
    ones = jnp.ones((B, C), jnp.float32)
    zeros = jnp.zeros((B, C), jnp.float32)
    y = instance_norm_act(y.reshape(B, H2 * W2, C), ones, zeros, act="relu")
    return y.reshape(B, H2, W2, C)


# ----------------------------------------------------------------------------
# Parameter initialization (deterministic, in-script)
# ----------------------------------------------------------------------------
def _conv_params(key, cout, cin, k):
    kw_, kb_ = jax.random.split(key)
    w = jax.random.normal(kw_, (cout, cin, k, k), jnp.float32) / jnp.sqrt(cin * k * k)
    b = 0.01 * jax.random.normal(kb_, (cout,), jnp.float32)
    return {"w": w, "b": b}


def _convT_params(key, cin, cout, k):
    kw_, kb_ = jax.random.split(key)
    w = jax.random.normal(kw_, (cin, cout, k, k), jnp.float32) / jnp.sqrt(cin * k * k)
    b = 0.01 * jax.random.normal(kb_, (cout,), jnp.float32)
    return {"w": w, "b": b}


def init_generator_params(key, n_downsampling=2, n_resnet_blocks=2):
    dims = [64 * 2 ** i for i in range(n_downsampling + 1)]
    top = dims[-1]
    num_adain = n_resnet_blocks * 2 * 2 * top   # 2 AdaIN per resblock, 2*C each
    keys = iter(jax.random.split(key, 64))

    p = {}
    p["conv_in"] = _conv_params(next(keys), 64, 3, 7)
    p["down"] = [_conv_params(next(keys), dims[i + 1], dims[i], 3)
                 for i in range(n_downsampling)]
    p["res"] = [{"c1": _conv_params(next(keys), top, top, 3),
                 "c2": _conv_params(next(keys), top, top, 3)}
                for _ in range(n_resnet_blocks)]
    p["up"] = [_convT_params(next(keys), dims[n_downsampling - i],
                             dims[n_downsampling - i - 1], 3)
               for i in range(n_downsampling)]
    p["conv_out"] = _conv_params(next(keys), 3, 64, 7)

    se = {}
    se["label"] = [
        _conv_params(next(keys), 16, 3, 7),
        _conv_params(next(keys), 32, 16, 4),
        _conv_params(next(keys), 64, 32, 4),
        _conv_params(next(keys), 64, 64, 4),
        _conv_params(next(keys), 64, 64, 4),
        _conv_params(next(keys), 64, 64, 4),
    ]
    se["style"] = [
        _conv_params(next(keys), 16, 3, 7),
        _conv_params(next(keys), 32, 16, 4),
        _conv_params(next(keys), 64, 32, 4),
        _conv_params(next(keys), 64, 64, 4),
        _conv_params(next(keys), 64, 64, 4),
        _conv_params(next(keys), 64, 64, 4),
    ]
    se["sft1"] = {n: _conv_params(next(keys), 64, 64, 1) for n in ("c1", "c2", "c3", "c4")}
    se["sft2"] = {n: _conv_params(next(keys), 64, 64, 1) for n in ("c1", "c2", "c3", "c4")}
    se["conv_last"] = _conv_params(next(keys), num_adain, 64, 1)
    p["style_encoder"] = se
    p["meta"] = {"n_down": n_downsampling, "n_res": n_resnet_blocks,
                 "top": top, "num_adain": num_adain}
    return p


# ----------------------------------------------------------------------------
# Module forward passes (internal layout: NHWC, lane-padded channels, bf16)
# ----------------------------------------------------------------------------
def sft_forward(p, x, y):
    """x: feature map, y: conditions.  conv1/conv3 are packed along N into one
    matmul; the x*gamma + beta modulation is fused into the conv2/conv4 one."""
    B, h, w, Cs = x.shape
    M = B * h * w
    xf = x.reshape(M, Cs)
    yf = y.reshape(M, Cs)

    def mat(q):  # 1x1 conv (Cout, Cin, 1, 1) -> lane-padded (Cs, Cs)
        co, ci = q["w"].shape[0], q["w"].shape[1]
        m = q["w"].reshape(co, ci).T
        return jnp.pad(m, ((0, Cs - ci), (0, Cs - co)))

    def vec(q):
        return jnp.pad(q["b"], (0, Cs - q["b"].shape[0]))

    wa = jnp.concatenate([mat(p["c1"]), mat(p["c3"])], axis=1)          # (Cs, 2Cs)
    ba = jnp.concatenate([vec(p["c1"]), vec(p["c3"])])
    hid = matmul_bias_act(yf, wa, ba, act="lrelu", out_dtype=jnp.bfloat16)

    wb = jnp.zeros((2 * Cs, 2 * Cs), jnp.float32)                       # block-diag
    wb = wb.at[:Cs, :Cs].set(mat(p["c2"]))
    wb = wb.at[Cs:, Cs:].set(mat(p["c4"]))
    bb = jnp.concatenate([vec(p["c2"]), vec(p["c4"])])
    out = sft_matmul_modulate(hid, wb, bb, xf)                          # (M, Cs)
    return out.reshape(B, h, w, Cs)


def style_encoder_forward(se, x, y):
    """x: labeled mask picture (image_ref), y: origin picture (input_ref)."""
    L = se["label"]
    y1 = conv2d_block(y, L[0], stride=1, padding=3, padtype="reflection", act="relu")
    y1 = conv2d_block(y1, L[1], stride=2, padding=1, padtype="reflection", act="relu")
    y1 = conv2d_block(y1, L[2], stride=2, padding=1, padtype="reflection", act="none")
    y2 = conv2d_block(y1, L[3], stride=2, padding=1, padtype="reflection", act="relu")
    y2 = conv2d_block(y2, L[4], stride=2, padding=1, padtype="reflection", act="relu")
    y2 = conv2d_block(y2, L[5], stride=2, padding=1, padtype="reflection", act="none")

    S = se["style"]
    x = conv2d_block(x, S[0], stride=1, padding=3, padtype="reflection", act="relu")
    x = conv2d_block(x, S[1], stride=2, padding=1, padtype="reflection", act="relu")
    x = conv2d_block(x, S[2], stride=2, padding=1, padtype="reflection", act="relu")
    x = sft_forward(se["sft1"], x, y1)
    x = conv2d_block(x, S[3], stride=2, padding=1, padtype="reflection", act="relu")
    x = conv2d_block(x, S[4], stride=2, padding=1, padtype="reflection", act="relu")
    x = conv2d_block(x, S[5], stride=2, padding=1, padtype="reflection", act="relu")
    x = sft_forward(se["sft2"], x, y2)

    B, H, W, Cs = x.shape
    pooled = adaptive_avg_pool_1(x.reshape(B, H * W, Cs))               # (B, 1, Cs)

    cl = se["conv_last"]                                                # 1x1 conv
    na, cin_l = cl["w"].shape[0], cl["w"].shape[1]
    wmat = jnp.pad(cl["w"].reshape(na, cin_l).T, ((0, Cs - cin_l), (0, 0)))
    return matmul_bias_act(pooled.reshape(B, Cs), wmat, cl["b"],
                           act="none", out_dtype=jnp.float32)           # (B, NA)


def generator_forward(params, inp, input_ref, image_ref):
    meta = params["meta"]
    top = meta["top"]
    B = inp.shape[0]

    # public layout NCHW -> internal NHWC (channels on the lane axis)
    x = jnp.transpose(inp, (0, 2, 3, 1))
    iref = jnp.transpose(input_ref, (0, 2, 3, 1))
    mref = jnp.transpose(image_ref, (0, 2, 3, 1))

    # ---- style encoder -> AdaIN parameters ----
    adain = style_encoder_forward(params["style_encoder"], mref, iref)  # (B, NA)
    # TODO(synk): momentum updates of AdaIN's running_mean/running_var buffers
    # are stateful and do not affect the forward output; omitted.

    # ---- main generator ----
    x = conv2d_block(x, params["conv_in"], stride=1, padding=3,
                     padtype="reflection", act="relu", norm=True)

    for d in params["down"]:
        x = conv2d_block(x, d, stride=2, padding=1, padtype="zero",
                         act="relu", norm=True)

    # assign_adain_params ordering: mean first, then std, consumed in layer
    # order; F.batch_norm's weight is the std slice and bias is the mean slice.
    off = 0
    for rb in params["res"]:
        mean1 = adain[:, off:off + top]
        std1 = adain[:, off + top:off + 2 * top]
        off += 2 * top
        h = conv2d_block(x, rb["c1"], stride=1, padding=1, padtype="reflection",
                         act="relu", norm=True, gamma=std1, beta=mean1)
        mean2 = adain[:, off:off + top]
        std2 = adain[:, off + top:off + 2 * top]
        off += 2 * top
        x = conv2d_block(h, rb["c2"], stride=1, padding=1, padtype="reflection",
                         act="none", norm=True, gamma=std2, beta=mean2,
                         residual=x)                       # fused x + AdaIN(conv)

    for u in params["up"]:
        x = conv_transpose_block(x, u)

    x = conv2d_block(x, params["conv_out"], stride=1, padding=3,
                     padtype="reflection", act="tanh", norm=False,
                     out_dtype=jnp.float32)
    x = x[..., :3]                                          # drop lane padding
    return jnp.transpose(x, (0, 3, 1, 2))                   # back to NCHW


# ----------------------------------------------------------------------------
if __name__ == "__main__":
    key = jax.random.PRNGKey(0)
    kp, k1, k2, k3 = jax.random.split(key, 4)

    # --- validate the sub-pixel ConvTranspose2d lowering against lax ---------
    kv1, kv2 = jax.random.split(jax.random.PRNGKey(1))
    tcin, tcout, th, tw = 8, 8, 4, 4
    xv = jax.random.normal(kv1, (1, th, tw, tcin), jnp.float32)
    wv = 0.2 * jax.random.normal(kv2, (tcin, tcout, 3, 3), jnp.float32)
    bv = jnp.zeros((tcout,), jnp.float32)
    got = conv_transpose_raw(xv, wv, bv)[..., :tcout].astype(jnp.float32)
    rhs = jnp.transpose(jnp.flip(wv, (2, 3)), (2, 3, 0, 1))   # HWIO, flipped
    ref = jax.lax.conv_general_dilated(
        xv, rhs, window_strides=(1, 1), padding=((1, 2), (1, 2)),
        lhs_dilation=(2, 2), dimension_numbers=("NHWC", "HWIO", "NHWC"))
    got, ref = jax.block_until_ready((got, ref))
    rel_err = float(jnp.max(jnp.abs(got - ref)) / (jnp.max(jnp.abs(ref)) + 1e-6))
    assert rel_err < 3e-2, f"ConvTranspose lowering mismatch: {rel_err}"

    # --- full generator forward ----------------------------------------------
    n_downsampling, n_resnet_blocks = 2, 2      # Generator(2, 2) -> small shapes
    params = init_generator_params(kp, n_downsampling, n_resnet_blocks)

    B = 2
    inp = jax.random.normal(k1, (B, 3, 16, 16), jnp.float32)        # `input`
    input_ref = jax.random.normal(k2, (B, 3, 32, 32), jnp.float32)  # `input_ref`
    image_ref = jax.random.normal(k3, (B, 3, 32, 32), jnp.float32)  # `image_ref`

    fwd = jax.jit(functools.partial(generator_forward, params))
    out = jax.block_until_ready(fwd(inp, input_ref, image_ref))
    assert out.shape == (B, 3, 16, 16), out.shape
    assert bool(jnp.all(jnp.isfinite(out)))
    print("KERNEL_OK")
</pallas_src>

<mosaic_0001>
module attributes {stable_mosaic.version = 11 : i64} {
  func.func @_conv_img_kernel(%arg0: i32, %arg1: memref<1x16x32xbf16, #tpu.memory_space<vmem>>, %arg2: memref<1x32x512xbf16, #tpu.memory_space<vmem>>, %arg3: memref<1x512xf32, #tpu.memory_space<vmem>>, %arg4: memref<1x1x512xf32, #tpu.memory_space<vmem>>, %arg5: memref<1x1x512xf32, #tpu.memory_space<vmem>>, %arg6: memref<1x16x512xbf16, #tpu.memory_space<vmem>>, %arg7: memref<16x512xf32, #tpu.memory_space<vmem>>) attributes {dimension_semantics = [#tpu.dimension_semantics<parallel>], iteration_bounds = array<i64: 1>, scalar_prefetch = 0 : i64, scratch_operands = 1 : i64, tpu.core_type = #tpu.core_type<tc>, window_params = [{transform_indices = @transform_0, window_bounds = array<i64: 1, 16, 32>}, {pipeline_mode = #tpu.pipeline_mode<synchronous>, transform_indices = @transform_1, window_bounds = array<i64: 1, 32, 512>}, {pipeline_mode = #tpu.pipeline_mode<synchronous>, transform_indices = @transform_2, window_bounds = array<i64: 1, 512>}, {transform_indices = @transform_3, window_bounds = array<i64: 1, 1, 512>}, {transform_indices = @transform_4, window_bounds = array<i64: 1, 1, 512>}, {transform_indices = @transform_5, window_bounds = array<i64: 1, 16, 512>}]} {
    %c0 = arith.constant 0 : index
    %c0_0 = arith.constant 0 : index
    %c0_1 = arith.constant 0 : index
    %0 = vector.load %arg1[%c0, %c0_0, %c0_1] : memref<1x16x32xbf16, #tpu.memory_space<vmem>>, vector<1x16x32xbf16>
    %1 = vector.shape_cast %0 : vector<1x16x32xbf16> to vector<16x32xbf16>
    %c0_2 = arith.constant 0 : index
    %c0_3 = arith.constant 0 : index
    %c0_4 = arith.constant 0 : index
    %2 = vector.load %arg2[%c0_2, %c0_3, %c0_4] : memref<1x32x512xbf16, #tpu.memory_space<vmem>>, vector<1x32x512xbf16>
    %3 = vector.shape_cast %2 : vector<1x32x512xbf16> to vector<32x512xbf16>
    %cst = arith.constant dense<0.000000e+00> : vector<16x512xf32>
    %4 = tpu.matmul %1, %3, %cst {dimension_numbers = #tpu.dot_dimension_numbers<[1], [0], [0], [1], [0, 0, 1, 1], [], []>} : vector<16x32xbf16>, vector<32x512xbf16>, vector<16x512xf32> -> vector<16x512xf32>
    %c0_5 = arith.constant 0 : index
    %c0_6 = arith.constant 0 : index
    %5 = vector.load %arg3[%c0_5, %c0_6] : memref<1x512xf32, #tpu.memory_space<vmem>>, vector<1x512xf32>
    %6 = vector.broadcast %5 : vector<1x512xf32> to vector<16x512xf32>
    %7 = arith.addf %4, %6 : vector<16x512xf32>
    %8 = arith.truncf %7 : vector<16x512xf32> to vector<16x512xbf16>
    %c0_7 = arith.constant 0 : index
    %c0_8 = arith.constant 0 : index
    %c0_9 = arith.constant 0 : index
    %9 = vector.load %arg6[%c0_7, %c0_8, %c0_9] : memref<1x16x512xbf16, #tpu.memory_space<vmem>>, vector<1x16x512xbf16>
    %10 = vector.shape_cast %9 : vector<1x16x512xbf16> to vector<16x512xbf16>
    %11 = vector.shape_cast %8 : vector<16x512xbf16> to vector<1x16x512xbf16>
    tpu.vector_store %arg6[%c0_7, %c0_8, %c0_9], %11 {strides = array<i32>} : memref<1x16x512xbf16, #tpu.memory_space<vmem>>, vector<1x16x512xbf16>,
    return
  }
  func.func @transform_0(%arg0: i32) -> (i32, i32, i32) {
    %c0_i32 = arith.constant 0 : i32
    %c0_i32_0 = arith.constant 0 : i32
    %c0_i32_1 = arith.constant 0 : i32
    return %arg0, %c0_i32, %c0_i32_0 : i32, i32, i32
  }
  func.func @transform_1(%arg0: i32) -> (i32, i32, i32) {
    %c0_i32 = arith.constant 0 : i32
    %c0_i32_0 = arith.constant 0 : i32
    %c0_i32_1 = arith.constant 0 : i32
    %c0_i32_2 = arith.constant 0 : i32
    return %c0_i32, %c0_i32_0, %c0_i32_1 : i32, i32, i32
  }
  func.func @transform_2(%arg0: i32) -> (i32, i32) {
    %c0_i32 = arith.constant 0 : i32
    %c0_i32_0 = arith.constant 0 : i32
    %c0_i32_1 = arith.constant 0 : i32
    return %c0_i32, %c0_i32_0 : i32, i32
  }
  func.func @transform_3(%arg0: i32) -> (i32, i32, i32) {
    %c0_i32 = arith.constant 0 : i32
    %c0_i32_0 = arith.constant 0 : i32
    %c0_i32_1 = arith.constant 0 : i32
    return %arg0, %c0_i32, %c0_i32_0 : i32, i32, i32
  }
  func.func @transform_4(%arg0: i32) -> (i32, i32, i32) {
    %c0_i32 = arith.constant 0 : i32
    %c0_i32_0 = arith.constant 0 : i32
    %c0_i32_1 = arith.constant 0 : i32
    return %arg0, %c0_i32, %c0_i32_0 : i32, i32, i32
  }
  func.func @transform_5(%arg0: i32) -> (i32, i32, i32) {
    %c0_i32 = arith.constant 0 : i32
    %c0_i32_0 = arith.constant 0 : i32
    %c0_i32_1 = arith.constant 0 : i32
    return %arg0, %c0_i32, %c0_i32_0 : i32, i32, i32
  }
}

</mosaic_0001>

<bundles_post_ra>
// kernel: tpu_custom_call.1
= control target key start
LH: loop header
LB: loop body
LE: loop exit
PB: predicated region body
PF: predicated region fallthrough
CT: control target
= control target key end

     0   :  { %10 = vsyncpa [#allocation4], 0  ;;  %s498_s0 = inlined_call_operand.hbm [shape: bf16[1,16,32], index: 0, kind: input, shape index: {}]   ;;  %s499_s1 = inlined_call_operand.hbm [shape: bf16[1,32,512], index: 1, kind: input, shape index: {}]   ;;  %s500_s2 = inlined_call_operand.hbm [shape: f32[1,512], index: 2, kind: input, shape index: {}]   ;;  %s501_s3 = inlined_call_operand.vmem [shape: f32[1,1,512], index: 3, kind: input, shape index: {}]   ;;  %s502_s4 = inlined_call_operand.hbm [shape: f32[1,1,512], index: 4, kind: input, shape index: {}]   ;;  %s503_s5 = inlined_call_operand.hbm [shape: bf16[1,16,512], index: 5, kind: output, shape index: {}]  }
   0x1   :  { %11 = vsyncpa [#allocation7], 0 }
   0x2   :  { %12 = vsyncpa [#allocation10], 0 }
   0x3   :  { %13 = vsyncpa [#allocation5], 0  ;;  %s437_s18 = smov [#allocation6]  }
   0x4   :  { %s31_s19 = sshll.u32 %s437_s18, 4  ;;  %s32_s19 = int_to_ptr.vmem [resolvable:$true] %s31_s19 }
   0x5   :  { %s337_s20 = scalar_lea.vmem %s32_s19, 1024  ;;  %p342_p1 = scmp.lt.s32.totalorder %s32_s19, %s32_s19 }
   0x6   :  { %p338_p0 = scmp.ne.s32.totalorder %s32_s19, %s337_s20  ;;  %p343_p2 = scmp.lt.s32.totalorder %s337_s20, %s337_s20 }
   0x8   :  { %p344_p3 = por %p343_p2, %p342_p1 }
   0xa   :  { %p345_p4 = pnand %p344_p3, %p338_p0 }
   0xc   :  { %348 = shalt.err (!%p345_p4)
}
   0xd   :  { %s438_s3 = smov 256   ;;  %s439_s21 = smov 16  }
   0xe   :  { %37 = dma.hbm_to_vmem [thread:$0]  %s499_s1, 1024, %s32_s19, [#allocation7], %s438_s3, %s438_s3, %s439_s21  }
   0xf   :  { %s440_s24 = smov [#allocation3]  }
  0x10   :  { %s19_s25 = sshll.u32 %s440_s24, 4  ;;  %s20_s25 = int_to_ptr.vmem [resolvable:$true] %s19_s25 }
  0x11   :  { %s357_s26 = scalar_lea.vmem %s20_s25, 128  ;;  %p362_p6 = scmp.lt.s32.totalorder %s20_s25, %s20_s25 }
  0x12   :  { %p358_p5 = scmp.ne.s32.totalorder %s20_s25, %s357_s26  ;;  %p363_p7 = scmp.lt.s32.totalorder %s357_s26, %s357_s26 }
  0x14   :  { %p364_p8 = por %p363_p7, %p362_p6 }
  0x16   :  { %p365_p9 = pnand %p364_p8, %p358_p5 }
  0x18   :  { %368 = shalt.err (!%p365_p9)
}
  0x19   :  { %s441_s27 = smov 64   ;;  %s442_s28 = smov 4  }
  0x1a   :  { %25 = dma.hbm_to_vmem [thread:$0]  %s498_s0, 128, %s20_s25, [#allocation4], %s441_s27, %s441_s27, %s442_s28  }
  0x1b   :  { %s443_s6 = smov [#allocation8]   ;;  %s444_s8 = smov [#allocation9]  }
  0x1c   :  { %s44_s7 = sshll.u32 %s443_s6, 4  ;;  %s56_s1 = sshll.u32 %s444_s8, 4  ;;  %s45_s7 = int_to_ptr.vmem [resolvable:$true] %s44_s7  ;;  %s57_s1 = int_to_ptr.vmem [resolvable:$true] %s56_s1 }
  0x1d   :  { %s377_s9 = scalar_lea.vmem %s45_s7, 64  ;;  %p382_p11 = scmp.lt.s32.totalorder %s45_s7, %s45_s7 }
  0x1e   :  { %p378_p10 = scmp.ne.s32.totalorder %s45_s7, %s377_s9  ;;  %p383_p12 = scmp.lt.s32.totalorder %s377_s9, %s377_s9 }
  0x20   :  { %p384_p13 = por %p383_p12, %p382_p11 }
  0x22   :  { %p385_p0 = pnand %p384_p13, %p378_p10 }
  0x24   :  { %388 = shalt.err (!%p385_p0)
}
  0x25   :  { %47 = dma.hbm_to_vmem [thread:$0]  %s500_s2, 64, %s45_s7, [#allocation7]  }
  0x26   :  { %s397_s12 = scalar_lea.vmem %s57_s1, 64  ;;  %p402_p2 = scmp.lt.s32.totalorder %s57_s1, %s57_s1 }
  0x27   :  { %p398_p1 = scmp.ne.s32.totalorder %s57_s1, %s397_s12  ;;  %p403_p3 = scmp.lt.s32.totalorder %s397_s12, %s397_s12 }
  0x29   :  { %p404_p4 = por %p403_p3, %p402_p2 }
  0x2b   :  { %p405_p5 = pnand %p404_p4, %p398_p1 }
  0x2d   :  { %408 = shalt.err (!%p405_p5)
}
  0x2e   :  { %59 = dma.hbm_to_vmem [thread:$0]  %s502_s4, 64, %s57_s1, [#allocation10]  }
  0x2f   :  { %429 = dma.done.wait [#allocation4], 128  }
  0x30   :  { %430 = vsyncadd [#allocation4], 4294967168 }
  0x31   :  { %431 = dma.done.wait [#allocation7], 1088  }
  0x32   :  { %432 = vsyncadd [#allocation7], 4294966208 }
  0x33   :  { %433 = dma.done.wait [#allocation10], 64  }
  0x34   :  { %434 = vsyncadd [#allocation10], 4294967232  ;;  %v445_v0 = vmov 0   ;;  %v316_v1 = vld [vmem:[#allocation6 + $0x24] ss:$16 sps:$4 sm:$0xff]   ;;  %v328_v9 = vld [vmem:[#allocation3] sm:$0xff]   ;;  %v85_v10 = vlaneseq }
  0x35   :  { %186 = vmatprep.mubr.bf16.mxu0 %v445_v0  ;;  %229 = vmatprep.mubr.bf16.mxu1 %v445_v0  ;;  %v318_v2 = vld [vmem:[#allocation6 + $0x2c] ss:$16 sps:$4 sm:$0xff]   ;;  %v320_v3 = vld [vmem:[#allocation6 + $0x20] ss:$16 sps:$4 sm:$0xff]   ;;  %v321_v4 = vld [vmem:[#allocation6 + $0x28] ss:$16 sps:$4 sm:$0xff]  }
  0x36   :  { %166 = vmatprep.subr.bf16.mxu0 %v316_v1  ;;  %209 = vmatprep.subr.bf16.mxu1 %v318_v2  ;;  %v322_v5 = vld [vmem:[#allocation6 + $0x4] ss:$16 sps:$4 sm:$0xff]   ;;  %v324_v6 = vld [vmem:[#allocation6 + $0xc] ss:$16 sps:$4 sm:$0xff]   ;;  %v326_v7 = vld [vmem:[#allocation6] ss:$16 sps:$4 sm:$0xff]  }
  0x37   :  { %167 = vmatpush1.bf16.msra.mxu0 %v320_v3  ;;  %210 = vmatpush1.bf16.msra.mxu1 %v321_v4  ;;  %v327_v8 = vld [vmem:[#allocation6 + $0x8] ss:$16 sps:$4 sm:$0xff]   ;;  %vm150_vm0 = vcmask 261120   ;;  %v86_v11 = vshrl.u32 %v85_v10, 7  ;;  %v83_v16 = vld [vmem:[#allocation8] sm:$0xf] }
  0x38   :  { %168 = vmatprep.subr.bf16.mxu0 %v322_v5  ;;  %211 = vmatprep.subr.bf16.mxu1 %v324_v6  ;;  %s446_s2 = smov [#allocation11]  }
  0x39   :  { %v87_v12 = vsub.s32 0, %v86_v11  ;;  %v95_v13 = vsub.s32 2, %v86_v11  ;;  %v91_v14 = vsub.s32 1, %v86_v11  ;;  %v99_v15 = vsub.s32 3, %v86_v11  ;;  %s273_s4 = sshll.u32 %s446_s2, 4  ;;  %s274_s4 = int_to_ptr.vmem [resolvable:$true] %s273_s4 }
  0x3a   :  { %s409_s14 = scalar_lea.vmem %s274_s4, 512  ;;  %p414_p7 = scmp.lt.s32.totalorder %s274_s4, %s274_s4 }
  0x3b   :  { %169 = vmatpush1.bf16.msra.mxu0 %v326_v7  ;;  %212 = vmatpush1.bf16.msra.mxu1 %v327_v8  ;;  %v88_v17 = vrot.slane %v83_v16, %v87_v12  ;;  %v96_v18 = vrot.slane %v83_v16, %v95_v13  ;;  %v92_v19 = vrot.slane %v83_v16, %v91_v14  ;;  %p410_p6 = scmp.ne.s32.totalorder %s274_s4, %s409_s14  ;;  %p415_p8 = scmp.lt.s32.totalorder %s409_s14, %s409_s14 }
  0x3c   :  { %v100_v20 = vrot.slane %v83_v16, %v99_v15 }
  0x3d   :  { %p416_p9 = por %p415_p8, %p414_p7 }
  0x3e   :  { %296 = vmatmul.mubr.msk.bf16.vlgmr.msra.gmra.mxu0 %vm150_vm0, %v328_v9  ;;  %297 = vmatmul.mubr.msk.bf16.vlgmr.msra.gmra.mxu1 %vm150_vm0, %v328_v9 }
  0x3f   :  { %p417_p10 = pnand %p416_p9, %p410_p6 }
  0xfe   :  { %v188_v21 = vpop.f32.mrf.mxu0  ;;  %v231_v22 = vpop.f32.mrf.mxu1 }
  0xff   :  { %v189_v25 = vadd.f32 %v188_v21, %v88_v17  ;;  %v232_v26 = vadd.f32 %v231_v22, %v96_v18 }
 0x100   :  { %v190_v23 = vpop.f32.mrf.mxu0  ;;  %v233_v24 = vpop.f32.mrf.mxu1 }
 0x101   :  { %v191_v27 = vadd.f32 %v190_v23, %v92_v19  ;;  %v234_v28 = vadd.f32 %v233_v24, %v100_v20 }
 0x102   :  { %v192_v29 = vpop.f32.mrf.mxu0  ;;  %v235_v30 = vpop.f32.mrf.mxu1 }
 0x103   :  { %v302_v31 = vpack.c.bf16 %v191_v27, %v189_v25  ;;  %v303_v32 = vpack.c.bf16 %v234_v28, %v232_v26  ;;  %v193_v35 = vadd.f32 %v192_v29, %v88_v17  ;;  %v236_v36 = vadd.f32 %v235_v30, %v96_v18 }
 0x104   :  { %v194_v33 = vpop.f32.mrf.mxu0  ;;  %v237_v34 = vpop.f32.mrf.mxu1 }
 0x105   :  { %264 = vst [vmem:[#allocation11] sm:$0xff] %v302_v31  ;;  %265 = vst [vmem:[#allocation11 + $0x8] sm:$0xff] %v303_v32  ;;  %v195_v37 = vadd.f32 %v194_v33, %v92_v19  ;;  %v238_v38 = vadd.f32 %v237_v34, %v100_v20 }
 0x107   :  { %v304_v39 = vpack.c.bf16 %v195_v37, %v193_v35  ;;  %v305_v40 = vpack.c.bf16 %v238_v38, %v236_v36 }
 0x109   :  { %266 = vst [vmem:[#allocation11 + $0x10] sm:$0xff] %v304_v39  ;;  %267 = vst [vmem:[#allocation11 + $0x18] sm:$0xff] %v305_v40 }
 0x10a   :  { %420 = shalt.err (!%p417_p10)
}
 0x10b   :  { %279 = dma.vmem_to_hbm [thread:$0]  %s274_s4, 512, %s503_s5, [#allocation5], %s438_s3, %s438_s3, %s439_s21  }
 0x10c   :  { %435 = dma.done.wait [#allocation5], 512  }
 0x10d   :  { %436 = vsyncadd [#allocation5], 4294966784 }
 0x10e   :  { %283 = vsyncpa [#allocation4], 1 }
 0x10f   :  { %284 = vsyncpa [#allocation7], 1 }
 0x110   :  { %285 = vsyncpa [#allocation10], 1 }
 0x111   :  { %286 = vsyncpa [#allocation5], 1 }

</bundles_post_ra>
